<compile_context>
chip_gen: v7x
topology: tpu7x:2x2x1
jax: 0.10.0
libtpu: 0.0.40
codegen_flags: <defaults>
</compile_context>

<pallas_src>
import functools
import math

import jax
import jax.numpy as jnp
from jax.experimental import pallas as pl
from jax.experimental.pallas import tpu as pltpu

_LANE = 128
_SUBLANE = 8


def _round_up(x, m):
    return ((x + m - 1) // m) * m


def _cdiv(a, b):
    return -(-a // b)


def _clamp(v, lo, hi):
    return max(lo, min(v, hi))


def _pick_tile(dim, candidates):
    for c in candidates:
        if c <= dim and dim % c == 0:
            return c
    return dim


@functools.lru_cache(maxsize=None)
def _vmem_capacity_bytes():
    """Per-core VMEM capacity (generation-aware); conservative fallback."""
    try:
        return int(pltpu.get_tpu_info().vmem_capacity_bytes)
    except Exception:
        return 64 << 20  # v7x per-TC size: safe lower bound everywhere


@functools.lru_cache(maxsize=None)
def _single_buffer_weights_supported():
    """Probe whether pipeline_mode=pl.Buffered(1) is accepted for resident
    (constant-index) blocks.  Falls back cleanly if not."""
    def _k(x_ref, w_ref, o_ref):
        o_ref[...] = x_ref[...] + w_ref[...]

    try:
        with jax.ensure_compile_time_eval():
            x = jnp.zeros((8, 128), jnp.float32)
            out = pl.pallas_call(
                _k,
                out_shape=jax.ShapeDtypeStruct((8, 128), jnp.float32),
                grid_spec=pltpu.PrefetchScalarGridSpec(
                    num_scalar_prefetch=0,
                    grid=(1,),
                    in_specs=[
                        pl.BlockSpec((8, 128), lambda i: (0, 0)),
                        pl.BlockSpec((8, 128), lambda i: (0, 0),
                                     pipeline_mode=pl.Buffered(1)),
                    ],
                    out_specs=pl.BlockSpec((8, 128), lambda i: (0, 0)),
                ),
            )(x, x)
            if isinstance(out, jax.core.Tracer):
                return False
            jax.block_until_ready(out)
        return True
    except Exception:
        return False


# ---------------------------------------------------------------------------
# Kernels
# ---------------------------------------------------------------------------

def _fused_mlp_kernel(x_ref, *refs, num_layers):
    """Whole MLP for one row tile; all weights resident in VMEM.
    Intermediates never touch HBM; dots accumulate in f32 and h is cast back
    to the weight dtype (bf16 fast path) between layers."""
    w_refs = refs[:num_layers]
    o_ref = refs[num_layers]
    h = x_ref[...]
    for l in range(num_layers):
        h = jnp.dot(h, w_refs[l][...], preferred_element_type=jnp.float32)
        if l < num_layers - 1:
            h = jnp.maximum(h, 0.0).astype(w_refs[l + 1].dtype)
    o_ref[...] = h.astype(o_ref.dtype)


def _streamed_mlp_kernel(x_ref, *refs, layer_shapes, layer_tk):
    """Weight-streaming MLP for one row tile.

    Activations stay in VMEM scratch (h_buf / f32 acc_buf); each layer's
    weights are streamed from HBM in (tk, N) row panels with a manual
    double-buffered DMA pipeline.  Intermediate activations never touch HBM.
    """
    num_layers = len(layer_shapes)
    w_hbm = refs[:num_layers]
    o_ref = refs[num_layers]
    h_buf = refs[num_layers + 1]
    acc_buf = refs[num_layers + 2]
    wbufs = refs[num_layers + 3:num_layers + 3 + num_layers]
    sem = refs[num_layers + 3 + num_layers]

    tm = h_buf.shape[0]
    in_pad = x_ref.shape[1]
    h_buf[:, :in_pad] = x_ref[...].astype(h_buf.dtype)

    for l in range(num_layers):
        k_dim, n_dim = layer_shapes[l]
        tk = layer_tk[l]
        nk = k_dim // tk
        wbuf = wbufs[l]

        acc_buf[:, :n_dim] = jnp.zeros((tm, n_dim), jnp.float32)

        pending = [None, None]

        def _start(kk, slot, _l=l, _tk=tk, _wbuf=wbuf):
            cp = pltpu.make_async_copy(
                w_hbm[_l].at[pl.ds(kk * _tk, _tk), :],
                _wbuf.at[slot],
                sem.at[slot])
            cp.start()
            pending[slot] = cp

        _start(0, 0)
        for k in range(nk):
            slot = k & 1
            pending[slot].wait()
            if k + 1 < nk:
                _start(k + 1, 1 - slot)
            acc_buf[:, :n_dim] += jnp.dot(
                h_buf[:, k * tk:(k + 1) * tk], wbuf[slot],
                preferred_element_type=jnp.float32)

        y = acc_buf[:, :n_dim]
        if l < num_layers - 1:
            h_buf[:, :n_dim] = jnp.maximum(y, 0.0).astype(h_buf.dtype)
        else:
            o_ref[...] = y.astype(o_ref.dtype)


def _tiled_layer_kernel(x_ref, w_ref, o_ref, acc_ref, *, apply_relu):
    """Last-resort single Linear layer: grid = (M, N, K), K innermost."""
    @pl.when(pl.program_id(2) == 0)
    def _():
        acc_ref[...] = jnp.zeros_like(acc_ref)

    acc_ref[...] += jnp.dot(x_ref[...], w_ref[...],
                            preferred_element_type=jnp.float32)

    @pl.when(pl.program_id(2) == pl.num_programs(2) - 1)
    def _():
        y = acc_ref[...]
        if apply_relu:
            y = jnp.maximum(y, 0.0)
        o_ref[...] = y.astype(o_ref.dtype)


# ---------------------------------------------------------------------------
# pallas_call wrappers
# ---------------------------------------------------------------------------

def _fused_forward(x2d, weights, *, tm, vmem_limit, out_dtype):
    """All layers in one pallas_call; weights fully resident in VMEM."""
    M, in_pad = x2d.shape
    n_out = weights[-1].shape[1]
    num_layers = len(weights)
    single_buf = _single_buffer_weights_supported()

    in_specs = [pl.BlockSpec((tm, in_pad), lambda i: (i, 0))]
    for w in weights:
        if single_buf:
            # Constant index map -> never re-fetched; single buffer halves the
            # resident-weight VMEM footprint (important on v7x's 64 MiB/TC).
            in_specs.append(pl.BlockSpec(w.shape, lambda i: (0, 0),
                                         pipeline_mode=pl.Buffered(1)))
        else:
            in_specs.append(pl.BlockSpec(w.shape, lambda i: (0, 0)))

    kernel = functools.partial(_fused_mlp_kernel, num_layers=num_layers)
    return pl.pallas_call(
        kernel,
        out_shape=jax.ShapeDtypeStruct((M, n_out), out_dtype),
        grid_spec=pltpu.PrefetchScalarGridSpec(
            num_scalar_prefetch=0,
            grid=(pl.cdiv(M, tm),),
            in_specs=in_specs,
            out_specs=pl.BlockSpec((tm, n_out), lambda i: (i, 0)),
        ),
        compiler_params=pltpu.CompilerParams(
            dimension_semantics=("parallel",),
            vmem_limit_bytes=vmem_limit,
        ),
    )(x2d, *weights)


def _plan_streamed(weights, *, tm, in_pad, act_isz, out_isz, budget):
    """Pick per-layer weight-panel heights and estimate the VMEM footprint of
    the weight-streaming path."""
    layer_tk = []
    wbuf_bytes = 0
    for w in weights:
        k_dim, n_dim = w.shape
        best = 128
        t = 256
        while t <= k_dim:
            if k_dim % t == 0 and 2 * t * n_dim * act_isz <= (4 << 20):
                best = t
            t += 128
        layer_tk.append(best)
        wbuf_bytes += 2 * best * n_dim * act_isz
    n_out = weights[-1].shape[1]
    max_w = max([in_pad] + [w.shape[1] for w in weights])
    total = (2 * tm * in_pad * act_isz       # pipelined x blocks
             + 2 * tm * n_out * out_isz      # pipelined out blocks
             + tm * max_w * act_isz          # h_buf
             + tm * max_w * 4                # f32 accumulator
             + wbuf_bytes                    # streamed weight double buffers
             + tm * 512 * 4)                 # dot temporaries allowance
    return total <= budget, total, tuple(layer_tk)


def _streamed_forward(x2d, weights, *, tm, layer_tk, vmem_limit, out_dtype):
    """Weight-streaming MLP: one pallas_call over M tiles; weights stay in
    HBM and are streamed per layer; activations stay in VMEM."""
    M, in_pad = x2d.shape
    num_layers = len(weights)
    n_out = weights[-1].shape[1]
    max_w = max([in_pad] + [w.shape[1] for w in weights])
    act_dtype = weights[0].dtype
    layer_shapes = tuple(w.shape for w in weights)

    in_specs = [pl.BlockSpec((tm, in_pad), lambda i: (i, 0))]
    in_specs += [pl.BlockSpec(memory_space=pl.ANY) for _ in weights]

    scratch = [pltpu.VMEM((tm, max_w), act_dtype),      # h_buf
               pltpu.VMEM((tm, max_w), jnp.float32)]    # acc_buf
    scratch += [pltpu.VMEM((2, layer_tk[l], layer_shapes[l][1]), act_dtype)
                for l in range(num_layers)]
    scratch += [pltpu.SemaphoreType.DMA((2,))]

    # TODO(synk): sweep deeper weight-panel buffering (3 slots) per generation.
    kernel = functools.partial(_streamed_mlp_kernel,
                               layer_shapes=layer_shapes,
                               layer_tk=tuple(layer_tk))
    return pl.pallas_call(
        kernel,
        out_shape=jax.ShapeDtypeStruct((M, n_out), out_dtype),
        grid_spec=pltpu.PrefetchScalarGridSpec(
            num_scalar_prefetch=0,
            grid=(pl.cdiv(M, tm),),
            in_specs=in_specs,
            out_specs=pl.BlockSpec((tm, n_out), lambda i: (i, 0)),
            scratch_shapes=scratch,
        ),
        compiler_params=pltpu.CompilerParams(
            dimension_semantics=("parallel",),
            vmem_limit_bytes=vmem_limit,
        ),
    )(x2d, *weights)


def _tiled_layer(x2d, wt, *, apply_relu, tm, out_dtype, vmem_cap):
    """Last resort: one Linear layer with (M, N, K) tiling + f32 accumulator."""
    M, K = x2d.shape
    Kw, N = wt.shape
    assert Kw == K, (Kw, K)

    itemsize = jnp.dtype(x2d.dtype).itemsize
    # Take the full N when the f32 accumulator stays small (X re-read once);
    # otherwise prefer 512/256-wide lane-dense tiles (384 hurts the 2x256 MXU).
    if tm * N * 4 <= (8 << 20):
        tn = N
    else:
        tn = _pick_tile(N, (512, 256, 128))
    tk = _pick_tile(K, (1024, 512, 256, 128))  # K is a 128-multiple post-prep

    est = (2 * (tm * tk + tk * tn) * itemsize
           + tm * tn * (4 + 2 * jnp.dtype(out_dtype).itemsize))
    vmem_limit = _clamp(est + (8 << 20), 32 << 20, int(vmem_cap * 0.9))

    kernel = functools.partial(_tiled_layer_kernel, apply_relu=apply_relu)
    return pl.pallas_call(
        kernel,
        out_shape=jax.ShapeDtypeStruct((M, N), out_dtype),
        grid_spec=pltpu.PrefetchScalarGridSpec(
            num_scalar_prefetch=0,
            grid=(pl.cdiv(M, tm), N // tn, K // tk),
            in_specs=[
                pl.BlockSpec((tm, tk), lambda i, j, k: (i, k)),
                pl.BlockSpec((tk, tn), lambda i, j, k: (k, j)),
            ],
            out_specs=pl.BlockSpec((tm, tn), lambda i, j, k: (i, j)),
            scratch_shapes=[pltpu.VMEM((tm, tn), jnp.float32)],
        ),
        compiler_params=pltpu.CompilerParams(
            dimension_semantics=("parallel", "parallel", "arbitrary"),
            vmem_limit_bytes=vmem_limit,
        ),
    )(x2d, wt)


# ---------------------------------------------------------------------------
# Parameters
# ---------------------------------------------------------------------------

def init_dense_params(key, in_dim, out_dim, layers=2, dtype=jnp.float32):
    """PyTorch nn.Linear(bias=False) layout/init: (out_features, in_features),
    U(-1/sqrt(fan_in), 1/sqrt(fan_in))."""
    params = []
    fan_in = in_dim
    for _ in range(layers):
        key, sub = jax.random.split(key)
        bound = 1.0 / math.sqrt(fan_in)
        w = jax.random.uniform(sub, (out_dim, fan_in), dtype=dtype,
                               minval=-bound, maxval=bound)
        params.append(w)
        fan_in = out_dim
    return params


def prepare_params(params, compute_dtype=None):
    """One-time weight preparation (outside the forward pass):
      * transpose to (in, out) so kernels issue plain MXU matmuls,
      * zero-pad EVERY dim (including layer-0 in_dim) to a multiple of 128 so
        all loads/stores are lane-dense and contractions never degenerate.
    Padding is exact (zeros).  Set compute_dtype=jnp.bfloat16 on v5e/v6e/v7x
    for the fast bf16 MXU path (activations are cast too; accumulation stays
    f32 inside the kernels)."""
    prepared = []
    prev_pad = None
    for l, w in enumerate(params):
        out_d, in_d = w.shape
        wt = jnp.swapaxes(w, 0, 1)
        if compute_dtype is not None:
            wt = wt.astype(compute_dtype)
        k_pad = _round_up(in_d, _LANE) if l == 0 else prev_pad
        n_pad = _round_up(out_d, _LANE)
        buf = jnp.zeros((k_pad, n_pad), wt.dtype)
        buf = buf.at[:in_d, :out_d].set(wt)
        prepared.append(buf)
        prev_pad = n_pad
    return prepared


# ---------------------------------------------------------------------------
# Forward
# ---------------------------------------------------------------------------

def dense_forward(inputs, prepared_weights, out_dim, *, tm=512):
    """Equivalent of Dense.forward: relu(Linear) for all but the last layer.

    inputs: (N_1, ..., N_k, in_dim) -> (N_1, ..., N_k, out_dim)
    prepared_weights: output of prepare_params().
    """
    orig_dtype = inputs.dtype
    lead = inputs.shape[:-1]
    in_dim = inputs.shape[-1]
    x = inputs.reshape(-1, in_dim)
    M = x.shape[0]

    act_dtype = prepared_weights[0].dtype
    in_pad = prepared_weights[0].shape[0]
    if in_pad != in_dim:
        x = jnp.pad(x, ((0, 0), (0, in_pad - in_dim)))
    if x.dtype != act_dtype:
        x = x.astype(act_dtype)

    n_out = prepared_weights[-1].shape[1]
    max_w = max([in_pad] + [w.shape[1] for w in prepared_weights])
    act_isz = jnp.dtype(act_dtype).itemsize
    out_isz = jnp.dtype(orig_dtype).itemsize
    w_bytes = sum(math.prod(w.shape) * w.dtype.itemsize
                  for w in prepared_weights)

    cap = _vmem_capacity_bytes()
    budget = int(cap * 0.7)

    tm_eff = min(tm, _round_up(M, _SUBLANE))
    # Small-VMEM chips (v7x 64 MiB/TC) with large resident weights: smaller tm.
    if cap <= (64 << 20) and w_bytes > (24 << 20):
        tm_eff = min(tm_eff, 256)
    # Ensure >=2 "parallel" grid steps so both v7x TensorCores get work.
    if M > 256 and _cdiv(M, tm_eff) < 2:
        tm_eff = max(128, _round_up(_cdiv(M, 2), _SUBLANE))

    w_buf_factor = 1 if _single_buffer_weights_supported() else 2
    fused_bytes = (w_buf_factor * w_bytes
                   + 2 * tm_eff * in_pad * act_isz      # pipelined x blocks
                   + 2 * tm_eff * n_out * out_isz       # pipelined out blocks
                   + 2 * tm_eff * max_w * 4             # live f32 h / dot out
                   + tm_eff * max_w * act_isz)          # relu/cast temporary

    if fused_bytes <= budget:
        vmem_limit = _clamp(fused_bytes + (16 << 20), 32 << 20,
                            int(cap * 0.9))
        y = _fused_forward(x, prepared_weights, tm=tm_eff,
                           vmem_limit=vmem_limit, out_dtype=orig_dtype)
    else:
        # Weight-streaming path: activations stay in VMEM, weights are
        # streamed from HBM; intermediates never round-trip HBM.
        chosen = None
        cand_tms = []
        for c in (tm_eff, 256, 128):
            c = min(c, tm_eff)
            if c not in cand_tms:
                cand_tms.append(c)
        for cand_tm in cand_tms:
            fits, sbytes, layer_tk = _plan_streamed(
                prepared_weights, tm=cand_tm, in_pad=in_pad,
                act_isz=act_isz, out_isz=out_isz, budget=budget)
            if fits:
                chosen = (cand_tm, sbytes, layer_tk)
                break
        if chosen is not None:
            cand_tm, sbytes, layer_tk = chosen
            vmem_limit = _clamp(sbytes + (16 << 20), 32 << 20, int(cap * 0.9))
            y = _streamed_forward(x, prepared_weights, tm=cand_tm,
                                  layer_tk=layer_tk, vmem_limit=vmem_limit,
                                  out_dtype=orig_dtype)
        else:
            # Last resort: per-layer tiled matmuls (intermediates hit HBM).
            n_layers = len(prepared_weights)
            y = x
            for l, w in enumerate(prepared_weights):
                y = _tiled_layer(
                    y, w, apply_relu=(l < n_layers - 1), tm=tm_eff,
                    out_dtype=(act_dtype if l < n_layers - 1 else orig_dtype),
                    vmem_cap=cap)

    if y.shape[-1] != out_dim:
        y = y[:, :out_dim]
    return y.reshape(*lead, out_dim)


if __name__ == "__main__":
    key = jax.random.PRNGKey(0)
    in_dim, out_dim, layers = 32, 32, 2
    batch, seq = 2, 8  # inputs shape (2, 8, 32)

    kp, kx = jax.random.split(key)
    params = init_dense_params(kp, in_dim, out_dim, layers=layers)
    prepared = prepare_params(params)  # one-time prep; no per-call transpose
    x = jax.random.normal(kx, (batch, seq, in_dim), dtype=jnp.float32)

    # Reference in plain JAX (same math as the PyTorch module).
    ref = x.reshape(-1, in_dim)
    for w in params[:-1]:
        ref = jnp.maximum(ref @ w.T, 0.0)
    ref = (ref @ params[-1].T).reshape(batch, seq, out_dim)

    # Warm the Buffered(1) capability probe eagerly (outside jit).
    _single_buffer_weights_supported()

    # 1) Fully-fused resident-weight path (f32, exact check).
    fwd = jax.jit(functools.partial(dense_forward, out_dim=out_dim))
    out = jax.block_until_ready(fwd(x, prepared))
    assert out.shape == (batch, seq, out_dim)
    assert jnp.allclose(out, ref, atol=1e-5, rtol=1e-5), float(
        jnp.max(jnp.abs(out - ref)))

    # 2) bf16 weights + activations (fast MXU path), f32 accumulation.
    prepared_bf16 = prepare_params(params, compute_dtype=jnp.bfloat16)
    out_bf16 = jax.block_until_ready(
        jax.jit(functools.partial(dense_forward, out_dim=out_dim))(
            x, prepared_bf16))
    assert out_bf16.dtype == jnp.float32
    assert jnp.allclose(out_bf16, ref, atol=3e-2, rtol=5e-2)

    # 3) Weight-streaming fallback (forced), exercising the double-buffered
    #    manual-DMA pipeline with >1 K step per layer.
    in2, hid2, layers2 = 256, 256, 3
    kp2, kx2 = jax.random.split(jax.random.PRNGKey(1))
    params2 = init_dense_params(kp2, in2, hid2, layers=layers2)
    prepared2 = prepare_params(params2)
    x2 = jax.random.normal(kx2, (64, in2), dtype=jnp.float32)
    ref2 = x2
    for w in params2[:-1]:
        ref2 = jnp.maximum(ref2 @ w.T, 0.0)
    ref2 = ref2 @ params2[-1].T
    y2 = _streamed_forward(x2, prepared2, tm=64,
                           layer_tk=(128,) * layers2,
                           vmem_limit=32 << 20, out_dtype=jnp.float32)
    y2 = jax.block_until_ready(y2)[:, :hid2]
    assert jnp.allclose(y2, ref2, atol=2e-3, rtol=2e-3), float(
        jnp.max(jnp.abs(y2 - ref2)))

    # 4) Last-resort per-layer tiled path (exact in f32).
    y3 = x.reshape(-1, in_dim)
    y3 = jnp.pad(y3, ((0, 0), (0, prepared[0].shape[0] - in_dim)))
    for l, w in enumerate(prepared):
        y3 = _tiled_layer(y3, w, apply_relu=(l < len(prepared) - 1),
                          tm=16, out_dtype=jnp.float32,
                          vmem_cap=_vmem_capacity_bytes())
    y3 = y3[:, :out_dim].reshape(batch, seq, out_dim)
    y3 = jax.block_until_ready(y3)
    assert jnp.allclose(y3, ref, atol=1e-5, rtol=1e-5)

    print("KERNEL_OK")
</pallas_src>

<mosaic_0001>
module attributes {stable_mosaic.version = 11 : i64} {
  func.func @_k(%arg0: i32, %arg1: memref<8x128xf32, #tpu.memory_space<vmem>>, %arg2: memref<8x128xf32, #tpu.memory_space<vmem>>, %arg3: memref<8x128xf32, #tpu.memory_space<vmem>>) attributes {dimension_semantics = [#tpu.dimension_semantics<arbitrary>], iteration_bounds = array<i64: 1>, scalar_prefetch = 0 : i64, scratch_operands = 0 : i64, tpu.core_type = #tpu.core_type<tc>, window_params = [{pipeline_mode = #tpu.pipeline_mode<synchronous>, transform_indices = @transform_0, window_bounds = array<i64: 8, 128>}, {pipeline_mode = #tpu.pipeline_mode<synchronous>, transform_indices = @transform_1, window_bounds = array<i64: 8, 128>}, {pipeline_mode = #tpu.pipeline_mode<synchronous>, transform_indices = @transform_2, window_bounds = array<i64: 8, 128>}]} {
    %c0 = arith.constant 0 : index
    %c0_0 = arith.constant 0 : index
    %0 = vector.load %arg1[%c0, %c0_0] : memref<8x128xf32, #tpu.memory_space<vmem>>, vector<8x128xf32>
    %c0_1 = arith.constant 0 : index
    %c0_2 = arith.constant 0 : index
    %1 = vector.load %arg2[%c0_1, %c0_2] : memref<8x128xf32, #tpu.memory_space<vmem>>, vector<8x128xf32>
    %2 = arith.addf %0, %1 : vector<8x128xf32>
    %c0_3 = arith.constant 0 : index
    %c0_4 = arith.constant 0 : index
    %3 = vector.load %arg3[%c0_3, %c0_4] : memref<8x128xf32, #tpu.memory_space<vmem>>, vector<8x128xf32>
    tpu.vector_store %arg3[%c0_3, %c0_4], %2 {strides = array<i32>} : memref<8x128xf32, #tpu.memory_space<vmem>>, vector<8x128xf32>,
    return
  }
  func.func @transform_0(%arg0: i32) -> (i32, i32) {
    %c0_i32 = arith.constant 0 : i32
    %c0_i32_0 = arith.constant 0 : i32
    %c0_i32_1 = arith.constant 0 : i32
    return %c0_i32, %c0_i32_0 : i32, i32
  }
  func.func @transform_1(%arg0: i32) -> (i32, i32) {
    %c0_i32 = arith.constant 0 : i32
    %c0_i32_0 = arith.constant 0 : i32
    %c0_i32_1 = arith.constant 0 : i32
    return %c0_i32, %c0_i32_0 : i32, i32
  }
  func.func @transform_2(%arg0: i32) -> (i32, i32) {
    %c0_i32 = arith.constant 0 : i32
    %c0_i32_0 = arith.constant 0 : i32
    %c0_i32_1 = arith.constant 0 : i32
    return %c0_i32, %c0_i32_0 : i32, i32
  }
}

module attributes {stable_mosaic.version = 11 : i64} {
  func.func @_fused_mlp_kernel(%arg0: i32, %arg1: memref<16x128xf32, #tpu.memory_space<vmem>>, %arg2: memref<128x128xf32, #tpu.memory_space<vmem>>, %arg3: memref<128x128xf32, #tpu.memory_space<vmem>>, %arg4: memref<16x128xf32, #tpu.memory_space<vmem>>) attributes {dimension_semantics = [#tpu.dimension_semantics<parallel>], iteration_bounds = array<i64: 1>, scalar_prefetch = 0 : i64, scratch_operands = 0 : i64, tpu.core_type = #tpu.core_type<tc>, window_params = [{transform_indices = @transform_0, window_bounds = array<i64: 16, 128>}, {pipeline_mode = #tpu.pipeline_mode<synchronous>, transform_indices = @transform_1, window_bounds = array<i64: 128, 128>}, {pipeline_mode = #tpu.pipeline_mode<synchronous>, transform_indices = @transform_2, window_bounds = array<i64: 128, 128>}, {transform_indices = @transform_3, window_bounds = array<i64: 16, 128>}]} {
    %c0 = arith.constant 0 : index
    %c0_0 = arith.constant 0 : index
    %0 = vector.load %arg1[%c0, %c0_0] : memref<16x128xf32, #tpu.memory_space<vmem>>, vector<16x128xf32>
    %c0_1 = arith.constant 0 : index
    %c0_2 = arith.constant 0 : index
    %1 = vector.load %arg2[%c0_1, %c0_2] : memref<128x128xf32, #tpu.memory_space<vmem>>, vector<128x128xf32>
    %cst = arith.constant dense<0.000000e+00> : vector<16x128xf32>
    %2 = tpu.matmul %0, %1, %cst {dimension_numbers = #tpu.dot_dimension_numbers<[1], [0], [0], [1], [0, 0, 1, 1], [], []>} : vector<16x128xf32>, vector<128x128xf32>, vector<16x128xf32> -> vector<16x128xf32>
    %cst_3 = arith.constant 0.000000e+00 : f32
    %3 = vector.broadcast %cst_3 : f32 to vector<16x128xf32>
    %4 = arith.maximumf %2, %3 : vector<16x128xf32>
    %c0_4 = arith.constant 0 : index
    %c0_5 = arith.constant 0 : index
    %5 = vector.load %arg3[%c0_4, %c0_5] : memref<128x128xf32, #tpu.memory_space<vmem>>, vector<128x128xf32>
    %cst_6 = arith.constant dense<0.000000e+00> : vector<16x128xf32>
    %6 = tpu.matmul %4, %5, %cst_6 {dimension_numbers = #tpu.dot_dimension_numbers<[1], [0], [0], [1], [0, 0, 1, 1], [], []>} : vector<16x128xf32>, vector<128x128xf32>, vector<16x128xf32> -> vector<16x128xf32>
    %c0_7 = arith.constant 0 : index
    %c0_8 = arith.constant 0 : index
    %7 = vector.load %arg4[%c0_7, %c0_8] : memref<16x128xf32, #tpu.memory_space<vmem>>, vector<16x128xf32>
    tpu.vector_store %arg4[%c0_7, %c0_8], %6 {strides = array<i32>} : memref<16x128xf32, #tpu.memory_space<vmem>>, vector<16x128xf32>,
    return
  }
  func.func @transform_0(%arg0: i32) -> (i32, i32) {
    %c0_i32 = arith.constant 0 : i32
    %c0_i32_0 = arith.constant 0 : i32
    return %arg0, %c0_i32 : i32, i32
  }
  func.func @transform_1(%arg0: i32) -> (i32, i32) {
    %c0_i32 = arith.constant 0 : i32
    %c0_i32_0 = arith.constant 0 : i32
    %c0_i32_1 = arith.constant 0 : i32
    return %c0_i32, %c0_i32_0 : i32, i32
  }
  func.func @transform_2(%arg0: i32) -> (i32, i32) {
    %c0_i32 = arith.constant 0 : i32
    %c0_i32_0 = arith.constant 0 : i32
    %c0_i32_1 = arith.constant 0 : i32
    return %c0_i32, %c0_i32_0 : i32, i32
  }
  func.func @transform_3(%arg0: i32) -> (i32, i32) {
    %c0_i32 = arith.constant 0 : i32
    %c0_i32_0 = arith.constant 0 : i32
    return %arg0, %c0_i32 : i32, i32
  }
}

</mosaic_0001>

<bundles_post_ra>
// kernel: tpu_custom_call.1
= control target key start
LH: loop header
LB: loop body
LE: loop exit
PB: predicated region body
PF: predicated region fallthrough
CT: control target
= control target key end

     0   :  { %7 = vsyncpa [#allocation3], 0  ;;  %s185_s0 = inlined_call_operand.hbm [shape: f32[8,128], index: 0, kind: input, shape index: {}]   ;;  %s186_s1 = inlined_call_operand.hbm [shape: f32[8,128], index: 1, kind: input, shape index: {}]   ;;  %s187_s2 = inlined_call_operand.hbm [shape: f32[8,128], index: 2, kind: output, shape index: {}]  }
   0x1   :  { %8 = vsyncpa [#allocation6], 0 }
   0x2   :  { %9 = vsyncpa [#allocation4], 0  ;;  %s131_s9 = smov [#allocation2]   ;;  %s132_s11 = smov [#allocation5]  }
   0x3   :  { %s16_s10 = sshll.u32 %s131_s9, 4  ;;  %s26_s12 = sshll.u32 %s132_s11, 4  ;;  %s17_s10 = int_to_ptr.vmem [resolvable:$true] %s16_s10  ;;  %s27_s12 = int_to_ptr.vmem [resolvable:$true] %s26_s12 }
   0x4   :  { %s59_s15 = scalar_lea.hbm %s185_s0, 128 }
   0x5   :  { %p60_p0 = scmp.ne.s32.totalorder %s185_s0, %s59_s15  ;;  %p63_p1 = scmp.lt.u32.totalorder %s59_s15, %s185_s0 }
   0x7   :  { %p65_p2 = pnand %p63_p1, %p60_p0 }
   0x9   :  { %68 = shalt.err (!%p65_p2)
}
   0xa   :  { %s69_s20 = scalar_lea.vmem %s17_s10, 128  ;;  %p74_p4 = scmp.lt.s32.totalorder %s17_s10, %s17_s10 }
   0xb   :  { %p70_p3 = scmp.ne.s32.totalorder %s17_s10, %s69_s20  ;;  %p75_p5 = scmp.lt.s32.totalorder %s69_s20, %s69_s20 }
   0xd   :  { %p76_p6 = por %p75_p5, %p74_p4 }
   0xf   :  { %p77_p7 = pnand %p76_p6, %p70_p3 }
  0x11   :  { %80 = shalt.err (!%p77_p7)
}
  0x12   :  { %19 = dma.hbm_to_vmem [thread:$0]  %s185_s0, 128, %s17_s10, [#allocation3]  }
  0x13   :  { %s81_s25 = scalar_lea.hbm %s186_s1, 128 }
  0x14   :  { %p82_p8 = scmp.ne.s32.totalorder %s186_s1, %s81_s25  ;;  %p85_p9 = scmp.lt.u32.totalorder %s81_s25, %s186_s1 }
  0x16   :  { %p87_p10 = pnand %p85_p9, %p82_p8 }
  0x18   :  { %90 = shalt.err (!%p87_p10)
}
  0x19   :  { %s91_s30 = scalar_lea.vmem %s27_s12, 128  ;;  %p96_p12 = scmp.lt.s32.totalorder %s27_s12, %s27_s12 }
  0x1a   :  { %p92_p11 = scmp.ne.s32.totalorder %s27_s12, %s91_s30  ;;  %p97_p13 = scmp.lt.s32.totalorder %s91_s30, %s91_s30 }
  0x1c   :  { %p98_p0 = por %p97_p13, %p96_p12 }
  0x1e   :  { %p99_p1 = pnand %p98_p0, %p92_p11 }
  0x20   :  { %102 = shalt.err (!%p99_p1)
}
  0x21   :  { %29 = dma.hbm_to_vmem [thread:$0]  %s186_s1, 128, %s27_s12, [#allocation6]  }
  0x22   :  { %125 = dma.done.wait [#allocation3], 128  }
  0x23   :  { %126 = vsyncadd [#allocation3], 4294967168 }
  0x24   :  { %127 = dma.done.wait [#allocation6], 128  }
  0x25   :  { %128 = vsyncadd [#allocation6], 4294967168  ;;  %s133_s4 = smov [#allocation7]   ;;  %v36_v0 = vld [vmem:[#allocation2] sm:$0xff]  ;;  %v37_v1 = vld [vmem:[#allocation5] sm:$0xff] }
  0x26   :  { %s46_s5 = sshll.u32 %s133_s4, 4  ;;  %v38_v2 = vadd.f32 %v37_v1, %v36_v0  ;;  %s47_s5 = int_to_ptr.vmem [resolvable:$true] %s46_s5 }
  0x27   :  { %s103_s6 = scalar_lea.vmem %s47_s5, 128  ;;  %p108_p3 = scmp.lt.s32.totalorder %s47_s5, %s47_s5 }
  0x28   :  { %39 = vst [vmem:[#allocation7] sm:$0xff] %v38_v2  ;;  %p104_p2 = scmp.ne.s32.totalorder %s47_s5, %s103_s6  ;;  %p109_p4 = scmp.lt.s32.totalorder %s103_s6, %s103_s6 }
  0x2a   :  { %p110_p5 = por %p109_p4, %p108_p3 }
  0x2c   :  { %p111_p6 = pnand %p110_p5, %p104_p2 }
  0x2e   :  { %114 = shalt.err (!%p111_p6)
}
  0x2f   :  { %s115_s8 = scalar_lea.hbm %s187_s2, 128 }
  0x30   :  { %p116_p7 = scmp.ne.s32.totalorder %s187_s2, %s115_s8  ;;  %p119_p8 = scmp.lt.u32.totalorder %s115_s8, %s187_s2 }
  0x32   :  { %p121_p9 = pnand %p119_p8, %p116_p7 }
  0x34   :  { %124 = shalt.err (!%p121_p9)
}
  0x35   :  { %49 = dma.vmem_to_hbm [thread:$0]  %s47_s5, 128, %s187_s2, [#allocation4]  }
  0x36   :  { %129 = dma.done.wait [#allocation4], 128  }
  0x37   :  { %130 = vsyncadd [#allocation4], 4294967168 }
  0x38   :  { %53 = vsyncpa [#allocation3], 1 }
  0x39   :  { %54 = vsyncpa [#allocation6], 1 }
  0x3a   :  { %55 = vsyncpa [#allocation4], 1 }

// kernel: dense_forward.1
= control target key start
LH: loop header
LB: loop body
LE: loop exit
PB: predicated region body
PF: predicated region fallthrough
CT: control target
= control target key end

     0   :  { %8 = vsyncpa [#allocation3], 0  ;;  %s518_s0 = inlined_call_operand.vmem [shape: f32[16,128], index: 0, kind: input, shape index: {}]   ;;  %s519_s1 = inlined_call_operand.hbm [shape: f32[128,128], index: 1, kind: input, shape index: {}]   ;;  %s520_s2 = inlined_call_operand.hbm [shape: f32[128,128], index: 2, kind: input, shape index: {}]   ;;  %s521_s3 = inlined_call_operand.vmem [shape: f32[16,128], index: 3, kind: output, shape index: {}]  }
   0x1   :  { %9 = vsyncpa [#allocation5], 0  ;;  %s458_s12 = smov [#allocation2]   ;;  %s410_s16 = scalar_lea.hbm %s519_s1, 2048 }
   0x2   :  { %s17_s13 = sshll.u32 %s458_s12, 4  ;;  %p411_p0 = scmp.ne.s32.totalorder %s519_s1, %s410_s16  ;;  %s18_s13 = int_to_ptr.vmem [resolvable:$true] %s17_s13 }
   0x3   :  { %p414_p1 = scmp.lt.u32.totalorder %s410_s16, %s519_s1 }
   0x5   :  { %p416_p2 = pnand %p414_p1, %p411_p0 }
   0x7   :  { %419 = shalt.err (!%p416_p2)
}
   0x8   :  { %s420_s21 = scalar_lea.vmem %s18_s13, 2048  ;;  %p425_p4 = scmp.lt.s32.totalorder %s18_s13, %s18_s13 }
   0x9   :  { %p421_p3 = scmp.ne.s32.totalorder %s18_s13, %s420_s21  ;;  %p426_p5 = scmp.lt.s32.totalorder %s420_s21, %s420_s21 }
   0xb   :  { %p427_p6 = por %p426_p5, %p425_p4 }
   0xd   :  { %p428_p7 = pnand %p427_p6, %p421_p3 }
   0xf   :  { %431 = shalt.err (!%p428_p7)
}
  0x10   :  { %s459_s22 = smov 128   ;;  %s460_s23 = smov 8  }
  0x11   :  { %23 = dma.hbm_to_vmem [thread:$0]  %s519_s1, 2048, %s18_s13, [#allocation3], %s459_s22, %s459_s22, %s460_s23  }
  0x12   :  { %s461_s26 = smov [#allocation4]   ;;  %s432_s30 = scalar_lea.hbm %s520_s2, 2048 }
  0x13   :  { %s29_s27 = sshll.u32 %s461_s26, 4  ;;  %p433_p8 = scmp.ne.s32.totalorder %s520_s2, %s432_s30  ;;  %s30_s27 = int_to_ptr.vmem [resolvable:$true] %s29_s27 }
  0x14   :  { %p436_p9 = scmp.lt.u32.totalorder %s432_s30, %s520_s2 }
  0x16   :  { %p438_p10 = pnand %p436_p9, %p433_p8 }
  0x18   :  { %441 = shalt.err (!%p438_p10)
}
  0x19   :  { %s442_s8 = scalar_lea.vmem %s30_s27, 2048  ;;  %p447_p12 = scmp.lt.s32.totalorder %s30_s27, %s30_s27 }
  0x1a   :  { %p443_p11 = scmp.ne.s32.totalorder %s30_s27, %s442_s8  ;;  %p448_p13 = scmp.lt.s32.totalorder %s442_s8, %s442_s8 }
  0x1c   :  { %p449_p0 = por %p448_p13, %p447_p12 }
  0x1e   :  { %p450_p1 = pnand %p449_p0, %p443_p11 }
  0x20   :  { %453 = shalt.err (!%p450_p1)
}
  0x21   :  { %35 = dma.hbm_to_vmem [thread:$0]  %s520_s2, 2048, %s30_s27, [#allocation5], %s459_s22, %s459_s22, %s460_s23  }
  0x22   :  { %454 = dma.done.wait [#allocation3], 2048  }
  0x23   :  { %455 = vsyncadd [#allocation3], 4294965248 }
  0x24   :  { %456 = dma.done.wait [#allocation5], 2048  }
  0x25   :  { %457 = vsyncadd [#allocation5], 4294965248  ;;  %v44_v0 = vld [vmem:[#allocation2] sm:$0xff]  ;;  %v45_v1 = vld [vmem:[#allocation2 + $0x8] sm:$0xff] }
  0x26   :  { %v46_v2 = vld [vmem:[#allocation2 + $0x10] sm:$0xff]  ;;  %v342_v3 = vpack.c.bf16 %v45_v1, %v44_v0  ;;  %v47_v4 = vld [vmem:[#allocation2 + $0x18] sm:$0xff]  ;;  %v48_v6 = vld [vmem:[#allocation2 + $0x20] sm:$0xff] }
  0x27   :  { %v346_v5 = vpack.c.bf16 %v47_v4, %v46_v2  ;;  %v49_v7 = vld [vmem:[#allocation2 + $0x28] sm:$0xff]  ;;  %v50_v9 = vld [vmem:[#allocation2 + $0x30] sm:$0xff]  ;;  %v51_v10 = vld [vmem:[#allocation2 + $0x38] sm:$0xff] }
  0x28   :  { %343 = vmatprep.subr.bf16.mxu0 %v342_v3  ;;  %v350_v8 = vpack.c.bf16 %v49_v7, %v48_v6  ;;  %v42_v11 = vld [vmem:[%s518_s0] sm:$0xff]  ;;  %v138_v13 = vld [vmem:[#allocation4 + $0x8] sm:$0xff]  ;;  %v139_v14 = vld [vmem:[#allocation4 + $0x10] sm:$0xff]  ;;  %v354_v20 = vpack.c.bf16 %v51_v10, %v50_v9 }
  0x29   :  { %345 = vmatpush3.bf16.msra.mxu0 %v342_v3  ;;  %304 = vmatprep.mubr.f32.mxu0 %v42_v11  ;;  %v137_v12 = vld [vmem:[#allocation4] sm:$0xff]  ;;  %v140_v16 = vld [vmem:[#allocation4 + $0x18] sm:$0xff]  ;;  %v142_v19 = vld [vmem:[#allocation4 + $0x28] sm:$0xff] }
  0x2a   :  { %347 = vmatprep.subr.bf16.mxu0 %v346_v5  ;;  %v374_v15 = vpack.c.bf16 %v138_v13, %v137_v12  ;;  %v378_v17 = vpack.c.bf16 %v140_v16, %v139_v14  ;;  %v141_v18 = vld [vmem:[#allocation4 + $0x20] sm:$0xff]  ;;  %v53_v22 = vld [vmem:[#allocation2 + $0x48] sm:$0xff]  ;;  %v143_v24 = vld [vmem:[#allocation4 + $0x30] sm:$0xff] }
  0x2b   :  { %v52_v21 = vld [vmem:[#allocation2 + $0x40] sm:$0xff]  ;;  %v382_v23 = vpack.c.bf16 %v142_v19, %v141_v18  ;;  %v144_v25 = vld [vmem:[#allocation4 + $0x38] sm:$0xff]  ;;  %v54_v27 = vld [vmem:[#allocation2 + $0x50] sm:$0xff] }
  0x2c   :  { %375 = vmatprep.subr.bf16.mxu1 %v374_v15  ;;  %v358_v26 = vpack.c.bf16 %v53_v22, %v52_v21  ;;  %v55_v28 = vld [vmem:[#allocation2 + $0x58] sm:$0xff]  ;;  %v386_v29 = vpack.c.bf16 %v144_v25, %v143_v24  ;;  %v145_v30 = vld [vmem:[#allocation4 + $0x40] sm:$0xff]  ;;  %v146_v31 = vld [vmem:[#allocation4 + $0x48] sm:$0xff] }
  0x2d   :  { %349 = vmatpush3.bf16.msra.mxu0 %v346_v5  ;;  %377 = vmatpush3.bf16.msra.mxu1 %v374_v15  ;;  %v362_v32 = vpack.c.bf16 %v55_v28, %v54_v27  ;;  %v56_v33 = vld [vmem:[#allocation2 + $0x60] sm:$0xff]  ;;  %v57_v34 = vld [vmem:[#allocation2 + $0x68] sm:$0xff]  ;;  %v390_v35 = vpack.c.bf16 %v146_v31, %v145_v30  ;;  %v147_v36 = vld [vmem:[#allocation4 + $0x50] sm:$0xff] }
  0x2e   :  { %351 = vmatprep.subr.bf16.mxu0 %v350_v8  ;;  %379 = vmatprep.subr.bf16.mxu1 %v378_v17  ;;  %v148_v37 = vld [vmem:[#allocation4 + $0x58] sm:$0xff]  ;;  %v366_v38 = vpack.c.bf16 %v57_v34, %v56_v33  ;;  %v58_v39 = vld [vmem:[#allocation2 + $0x70] sm:$0xff]  ;;  %v149_v42 = vld [vmem:[#allocation4 + $0x60] sm:$0xff] }
  0x2f   :  { %v59_v40 = vld [vmem:[#allocation2 + $0x78] sm:$0xff]  ;;  %v394_v41 = vpack.c.bf16 %v148_v37, %v147_v36  ;;  %v150_v43 = vld [vmem:[#allocation4 + $0x68] sm:$0xff]  ;;  %v151_v47 = vld [vmem:[#allocation4 + $0x70] sm:$0xff] }
  0x30   :  { %v370_v44 = vpack.c.bf16 %v59_v40, %v58_v39  ;;  %v398_v45 = vpack.c.bf16 %v150_v43, %v149_v42  ;;  %v43_v46 = vld [vmem:[%s518_s0 + $0x8] sm:$0xff]  ;;  %v152_v48 = vld [vmem:[#allocation4 + $0x78] sm:$0xff] }
  0x31   :  { %353 = vmatpush3.bf16.msra.mxu0 %v350_v8  ;;  %381 = vmatpush3.bf16.msra.mxu1 %v378_v17  ;;  %v402_v49 = vpack.c.bf16 %v152_v48, %v151_v47 }
  0x32   :  { %355 = vmatprep.subr.bf16.mxu0 %v354_v20  ;;  %383 = vmatprep.subr.bf16.mxu1 %v382_v23 }
  0x35   :  { %357 = vmatpush3.bf16.msra.mxu0 %v354_v20  ;;  %385 = vmatpush3.bf16.msra.mxu1 %v382_v23 }
  0x36   :  { %359 = vmatprep.subr.bf16.mxu0 %v358_v26  ;;  %387 = vmatprep.subr.bf16.mxu1 %v386_v29 }
  0x39   :  { %361 = vmatpush3.bf16.msra.mxu0 %v358_v26  ;;  %389 = vmatpush3.bf16.msra.mxu1 %v386_v29 }
  0x3a   :  { %363 = vmatprep.subr.bf16.mxu0 %v362_v32  ;;  %391 = vmatprep.subr.bf16.mxu1 %v390_v35 }
  0x3d   :  { %365 = vmatpush3.bf16.msra.mxu0 %v362_v32  ;;  %393 = vmatpush3.bf16.msra.mxu1 %v390_v35 }
  0x3e   :  { %367 = vmatprep.subr.bf16.mxu0 %v366_v38  ;;  %395 = vmatprep.subr.bf16.mxu1 %v394_v41 }
  0x41   :  { %369 = vmatpush3.bf16.msra.mxu0 %v366_v38  ;;  %397 = vmatpush3.bf16.msra.mxu1 %v394_v41 }
  0x42   :  { %371 = vmatprep.subr.bf16.mxu0 %v370_v44  ;;  %399 = vmatprep.subr.bf16.mxu1 %v398_v45 }
  0x45   :  { %373 = vmatpush3.bf16.msra.mxu0 %v370_v44  ;;  %401 = vmatpush3.bf16.msra.mxu1 %v398_v45 }
  0x46   :  { %403 = vmatprep.subr.bf16.mxu1 %v402_v49 }
  0x48   :  { %305 = vmatmul.mubr.f32.vlgmr.msra.gmra.mrb[0].mxu0 %v43_v46 }
  0x49   :  { %405 = vmatpush3.bf16.msra.mxu1 %v402_v49 }
 0x11b   :  { %v306_v50 = vpop.f32.mrb[0].mxu0 }
 0x11c   :  { %v126_v51 = vpop.f32.mrb[1].mxu0  ;;  %v136_v53 = vmax.f32 %v306_v50, 0.0 }
 0x11d   :  { %v135_v52 = vmax.f32 %v126_v51, 0.0 }
 0x11f   :  { %339 = vmatprep.mubr.f32.mxu1 %v135_v52 }
 0x120   :  { %340 = vmatmul.mubr.f32.vlgmr.msra.gmra.mrb[0].mxu1 %v136_v53 }
 0x1f3   :  { %v341_v54 = vpop.f32.mrb[0].mxu1 }
 0x1f4   :  { %229 = vst [vmem:[%s521_s3 + $0x8] sm:$0xff] %v341_v54  ;;  %v219_v55 = vpop.f32.mrb[1].mxu1 }
 0x1f5   :  { %228 = vst [vmem:[%s521_s3] sm:$0xff] %v219_v55 }
 0x1f6   :  { %234 = vsyncpa [#allocation3], 1 }
 0x1f7   :  { %235 = vsyncpa [#allocation5], 1 }

</bundles_post_ra>
